<compile_context>
chip_gen: v6e
topology: v6e:2x2x1
jax: 0.10.0
libtpu: 0.0.40
codegen_flags: <defaults>
</compile_context>

<pallas_src>
import jax
import jax.numpy as jnp
from jax import lax
from jax.experimental import pallas as pl
from jax.experimental.pallas import tpu as pltpu

EPS = 1e-5
LANES = 128
VMEM_LIMIT = 32 * 1024 * 1024  # explicit, safe on v5e/v6e (128 MiB) and v7x (64 MiB)


def _round_up(x, m):
    return (x + m - 1) // m * m


def _pick_tile_m(m, kdim, cpad):
    """Largest M-tile that keeps double-buffered blocks well inside VMEM.

    Bytes per row of tile (2x buffered inputs/outputs, both passes):
      pass 1: patches bf16 in (2*kdim) + y f32 out (4*cpad)
      pass 2: y f32 in (4*cpad)        + out f32  (4*cpad)
    Budget is conservative so the same choice fits v7x's smaller (64 MiB) VMEM.
    """
    per_row = 2 * (2 * kdim + 4 * cpad) + 2 * (4 * cpad + 4 * cpad)
    budget = 20 * 1024 * 1024
    t = min(budget // per_row, 2048)        # diminishing returns beyond ~2k rows
    t = min(t, _round_up(m, 256))           # do not over-pad tiny problems
    return max(128, (t // 128) * 128)


def _pass1_kernel(patches_ref, w_ref, y_ref, stats_ref):
    """MXU matmul (bf16 x bf16 -> f32) + per-tile per-channel sum / sumsq."""
    y = jnp.dot(patches_ref[...], w_ref[...], preferred_element_type=jnp.float32)
    y_ref[...] = y
    s = jnp.sum(y, axis=0, keepdims=True)        # (1, Cpad)  -- XLU reduce
    ss = jnp.sum(y * y, axis=0, keepdims=True)   # (1, Cpad)
    # One full (8, Cpad) unmasked store; rows 0/1 carry sum/sumsq, rest are 0.
    rows = lax.broadcasted_iota(jnp.int32, stats_ref.shape, 0)
    stats_ref[...] = jnp.where(rows == 0, s, 0.0) + jnp.where(rows == 1, ss, 0.0)


def _pass2_kernel(y_ref, scale_ref, shift_ref, out_ref):
    """Normalize with folded affine (one FMA) + ReLU.  out aliases y in HBM."""
    out_ref[...] = jnp.maximum(y_ref[...] * scale_ref[...] + shift_ref[...], 0.0)


def upconv_bn_relu(x_nchw, w_t, bias, gamma, beta, *, tile_m=None):
    """Forward of _UpconvBNReluBlock.

    x_nchw: (N, Cin, H, W)      float32
    w_t:    (Cin, Cout, K, K)   ConvTranspose2d weight (PyTorch layout)
    bias:   (Cout,)             ConvTranspose2d bias (cancels under training BN)
    gamma:  (Cout,)             BatchNorm2d weight
    beta:   (Cout,)             BatchNorm2d bias
    returns (N, Cout, H+K-1, W+K-1) float32
    """
    del bias  # a per-channel constant added before training-mode BN cancels exactly

    N, Cin, H, W = x_nchw.shape
    Cin_w, Cout, K, K2 = w_t.shape
    assert Cin == Cin_w and K == K2
    OH, OW = H + K - 1, W + K - 1
    M = N * OH * OW
    Kdim = K * K * Cin
    Cpad = _round_up(Cout, LANES)                 # lane-dense output columns

    if tile_m is None:
        tile_m = _pick_tile_m(M, Kdim, Cpad)
    assert tile_m % 8 == 0
    Mpad = _round_up(M, tile_m)
    n_tiles = Mpad // tile_m

    # conv_transpose(stride=1, pad=0) == full conv with flipped, swapped weight.
    w_conv = jnp.transpose(w_t[:, :, ::-1, ::-1], (1, 0, 2, 3))               # (Cout, Cin, K, K)
    w_mat = jnp.transpose(w_conv, (2, 3, 1, 0)).reshape(Kdim, Cout)           # (K*K*Cin, Cout)
    w_mat = jnp.pad(w_mat, ((0, 0), (0, Cpad - Cout))).astype(jnp.bfloat16)   # zero-pad lanes

    # im2col glue: pad by K-1 and gather K*K shifted views.  bf16 halves the HBM
    # bytes of this blown-up copy (MXU operands only; accumulation stays f32).
    x_nhwc = jnp.transpose(x_nchw, (0, 2, 3, 1))
    pad = K - 1
    xpad = jnp.pad(x_nhwc, ((0, 0), (pad, pad), (pad, pad), (0, 0)))
    cols = [xpad[:, kh:kh + OH, kw:kw + OW, :] for kh in range(K) for kw in range(K)]
    patches = jnp.concatenate(cols, axis=-1).reshape(M, Kdim)
    patches = jnp.pad(patches, ((0, Mpad - M), (0, 0))).astype(jnp.bfloat16)  # zero rows -> 0 in stats

    cparams = pltpu.CompilerParams(dimension_semantics=("parallel",),
                                   vmem_limit_bytes=VMEM_LIMIT)

    # ---- pass 1: tiled MXU matmul + per-tile BN partial sums -----------------
    y_flat, stats = pl.pallas_call(
        _pass1_kernel,
        out_shape=(jax.ShapeDtypeStruct((Mpad, Cpad), jnp.float32),
                   jax.ShapeDtypeStruct((8 * n_tiles, Cpad), jnp.float32)),
        grid=(n_tiles,),
        in_specs=[
            pl.BlockSpec((tile_m, Kdim), lambda i: (i, 0)),
            pl.BlockSpec((Kdim, Cpad), lambda i: (0, 0)),   # constant block: stays resident
        ],
        out_specs=(
            pl.BlockSpec((tile_m, Cpad), lambda i: (i, 0)),
            pl.BlockSpec((8, Cpad), lambda i: (i, 0)),
        ),
        compiler_params=cparams,
        cost_estimate=pl.CostEstimate(
            flops=2 * Mpad * Kdim * Cpad,
            transcendentals=0,
            bytes_accessed=(patches.size * 2 + w_mat.size * 2
                            + Mpad * Cpad * 4 + 8 * n_tiles * Cpad * 4)),
    )(patches, w_mat)

    # ---- tiny per-channel reduction + BN affine fold (plain JAX) -------------
    stats = stats.reshape(n_tiles, 8, Cpad)
    ch_sum = jnp.sum(stats[:, 0, :], axis=0)
    ch_sumsq = jnp.sum(stats[:, 1, :], axis=0)
    mean = ch_sum / M                                      # true M: padded rows add 0
    var = jnp.maximum(ch_sumsq / M - mean * mean, 0.0)     # biased variance (training BN)
    inv_std = lax.rsqrt(var + EPS)
    gamma_p = jnp.pad(gamma.astype(jnp.float32), (0, Cpad - Cout))
    beta_p = jnp.pad(beta.astype(jnp.float32), (0, Cpad - Cout))
    scale = (gamma_p * inv_std).reshape(1, Cpad)
    shift = (beta_p - mean * gamma_p * inv_std).reshape(1, Cpad)

    # ---- pass 2: normalize (one FMA) + ReLU, overwriting y's HBM buffer ------
    out_flat = pl.pallas_call(
        _pass2_kernel,
        out_shape=jax.ShapeDtypeStruct((Mpad, Cpad), jnp.float32),
        grid=(n_tiles,),
        in_specs=[
            pl.BlockSpec((tile_m, Cpad), lambda i: (i, 0)),
            pl.BlockSpec((1, Cpad), lambda i: (0, 0)),
            pl.BlockSpec((1, Cpad), lambda i: (0, 0)),
        ],
        out_specs=pl.BlockSpec((tile_m, Cpad), lambda i: (i, 0)),
        input_output_aliases={0: 0},     # reuse y_flat's HBM buffer in place
        compiler_params=cparams,
        cost_estimate=pl.CostEstimate(
            flops=3 * Mpad * Cpad, transcendentals=0,
            bytes_accessed=3 * Mpad * Cpad * 4),
    )(y_flat, scale, shift)

    out = out_flat[:M, :Cout].reshape(N, OH, OW, Cout)
    return jnp.transpose(out, (0, 3, 1, 2))


def _reference(x, w_t, bias, gamma, beta):
    """Pure-JAX reference matching PyTorch semantics.  Conv operands are rounded
    to bf16 exactly like the kernel's MXU inputs (accumulation stays f32)."""
    K = w_t.shape[2]
    xr = x.astype(jnp.bfloat16).astype(jnp.float32)
    wr = w_t.astype(jnp.bfloat16).astype(jnp.float32)
    w_conv = jnp.transpose(wr[:, :, ::-1, ::-1], (1, 0, 2, 3))
    y = lax.conv_general_dilated(
        xr, w_conv, window_strides=(1, 1),
        padding=[(K - 1, K - 1), (K - 1, K - 1)],
        dimension_numbers=('NCHW', 'OIHW', 'NCHW'),
        precision=lax.Precision.HIGHEST)
    y = y + bias.reshape(1, -1, 1, 1)
    mean = jnp.mean(y, axis=(0, 2, 3), keepdims=True)
    var = jnp.mean((y - mean) ** 2, axis=(0, 2, 3), keepdims=True)
    yn = (y - mean) / jnp.sqrt(var + EPS) * gamma.reshape(1, -1, 1, 1) + beta.reshape(1, -1, 1, 1)
    return jnp.maximum(yn, 0.0)


if __name__ == "__main__":
    # Small shapes consistent with the module: in_ch=4, out_ch=8, kernel_size=3.
    N, Cin, H, W = 2, 4, 16, 16
    Cout, K = 8, 3

    key = jax.random.PRNGKey(0)
    kx, kw, kb, kg, kbe = jax.random.split(key, 5)

    x = jax.random.normal(kx, (N, Cin, H, W), dtype=jnp.float32)
    fan = Cin * K * K
    w_t = jax.random.normal(kw, (Cin, Cout, K, K), dtype=jnp.float32) / jnp.sqrt(float(fan))
    bias = 0.1 * jax.random.normal(kb, (Cout,), dtype=jnp.float32)
    gamma = 1.0 + 0.1 * jax.random.normal(kg, (Cout,), dtype=jnp.float32)
    beta = 0.1 * jax.random.normal(kbe, (Cout,), dtype=jnp.float32)

    # tile_m=256 -> M = 2*18*18 = 648 is zero-padded to 768 and run as a
    # 3-step "parallel" grid (exercises the tiled two-pass BN path).
    out = upconv_bn_relu(x, w_t, bias, gamma, beta, tile_m=256)
    out = jax.block_until_ready(out)

    ref = _reference(x, w_t, bias, gamma, beta)
    assert out.shape == (N, Cout, H + K - 1, W + K - 1), out.shape
    max_err = float(jnp.max(jnp.abs(out - ref)))
    assert jnp.allclose(out, ref, atol=2e-3, rtol=2e-3), max_err

    print("KERNEL_OK")
</pallas_src>

<mosaic_0001>
module attributes {stable_mosaic.version = 11 : i64} {
  func.func @_pass1_kernel(%arg0: i32, %arg1: memref<256x36xbf16, #tpu.memory_space<vmem>>, %arg2: memref<36x128xbf16, #tpu.memory_space<vmem>>, %arg3: memref<256x128xf32, #tpu.memory_space<vmem>>, %arg4: memref<8x128xf32, #tpu.memory_space<vmem>>) attributes {dimension_semantics = [#tpu.dimension_semantics<parallel>], iteration_bounds = array<i64: 3>, scalar_prefetch = 0 : i64, scratch_operands = 0 : i64, tpu.core_type = #tpu.core_type<tc>, window_params = [{transform_indices = @transform_0, window_bounds = array<i64: 256, 36>}, {pipeline_mode = #tpu.pipeline_mode<synchronous>, transform_indices = @transform_1, window_bounds = array<i64: 36, 128>}, {transform_indices = @transform_2, window_bounds = array<i64: 256, 128>}, {transform_indices = @transform_3, window_bounds = array<i64: 8, 128>}]} {
    %c0 = arith.constant 0 : index
    %c0_0 = arith.constant 0 : index
    %0 = vector.load %arg1[%c0, %c0_0] : memref<256x36xbf16, #tpu.memory_space<vmem>>, vector<256x36xbf16>
    %c0_1 = arith.constant 0 : index
    %c0_2 = arith.constant 0 : index
    %1 = vector.load %arg2[%c0_1, %c0_2] : memref<36x128xbf16, #tpu.memory_space<vmem>>, vector<36x128xbf16>
    %cst = arith.constant dense<0.000000e+00> : vector<256x128xf32>
    %2 = tpu.matmul %0, %1, %cst {dimension_numbers = #tpu.dot_dimension_numbers<[1], [0], [0], [1], [0, 0, 1, 1], [], []>} : vector<256x36xbf16>, vector<36x128xbf16>, vector<256x128xf32> -> vector<256x128xf32>
    %c0_3 = arith.constant 0 : index
    %c0_4 = arith.constant 0 : index
    %3 = vector.load %arg3[%c0_3, %c0_4] : memref<256x128xf32, #tpu.memory_space<vmem>>, vector<256x128xf32>
    tpu.vector_store %arg3[%c0_3, %c0_4], %2 {strides = array<i32>} : memref<256x128xf32, #tpu.memory_space<vmem>>, vector<256x128xf32>,
    %cst_5 = arith.constant dense<0.000000e+00> : vector<128xf32>
    %4 = vector.multi_reduction <add>, %2, %cst_5 [0] : vector<256x128xf32> to vector<128xf32>
    %5 = vector.shape_cast %4 : vector<128xf32> to vector<1x128xf32>
    %6 = arith.mulf %2, %2 : vector<256x128xf32>
    %cst_6 = arith.constant dense<0.000000e+00> : vector<128xf32>
    %7 = vector.multi_reduction <add>, %6, %cst_6 [0] : vector<256x128xf32> to vector<128xf32>
    %8 = vector.shape_cast %7 : vector<128xf32> to vector<1x128xf32>
    %9 = tpu.iota {dimensions = array<i32: 0>} : vector<8x128xi32>
    %c0_i32 = arith.constant 0 : i32
    %10 = vector.broadcast %c0_i32 : i32 to vector<8x128xi32>
    %11 = arith.cmpi eq, %9, %10 : vector<8x128xi32>
    %cst_7 = arith.constant 0.000000e+00 : f32
    %12 = vector.shape_cast %5 : vector<1x128xf32> to vector<1x128xf32>
    %13 = vector.broadcast %12 : vector<1x128xf32> to vector<8x128xf32>
    %14 = vector.broadcast %cst_7 : f32 to vector<8x128xf32>
    %15 = arith.select %11, %13, %14 : vector<8x128xi1>, vector<8x128xf32>
    %c1_i32 = arith.constant 1 : i32
    %16 = vector.broadcast %c1_i32 : i32 to vector<8x128xi32>
    %17 = arith.cmpi eq, %9, %16 : vector<8x128xi32>
    %cst_8 = arith.constant 0.000000e+00 : f32
    %18 = vector.shape_cast %8 : vector<1x128xf32> to vector<1x128xf32>
    %19 = vector.broadcast %18 : vector<1x128xf32> to vector<8x128xf32>
    %20 = vector.broadcast %cst_8 : f32 to vector<8x128xf32>
    %21 = arith.select %17, %19, %20 : vector<8x128xi1>, vector<8x128xf32>
    %22 = arith.addf %15, %21 : vector<8x128xf32>
    %c0_9 = arith.constant 0 : index
    %c0_10 = arith.constant 0 : index
    %23 = vector.load %arg4[%c0_9, %c0_10] : memref<8x128xf32, #tpu.memory_space<vmem>>, vector<8x128xf32>
    tpu.vector_store %arg4[%c0_9, %c0_10], %22 {strides = array<i32>} : memref<8x128xf32, #tpu.memory_space<vmem>>, vector<8x128xf32>,
    return
  }
  func.func @transform_0(%arg0: i32) -> (i32, i32) {
    %c0_i32 = arith.constant 0 : i32
    %c0_i32_0 = arith.constant 0 : i32
    return %arg0, %c0_i32 : i32, i32
  }
  func.func @transform_1(%arg0: i32) -> (i32, i32) {
    %c0_i32 = arith.constant 0 : i32
    %c0_i32_0 = arith.constant 0 : i32
    %c0_i32_1 = arith.constant 0 : i32
    return %c0_i32, %c0_i32_0 : i32, i32
  }
  func.func @transform_2(%arg0: i32) -> (i32, i32) {
    %c0_i32 = arith.constant 0 : i32
    %c0_i32_0 = arith.constant 0 : i32
    return %arg0, %c0_i32 : i32, i32
  }
  func.func @transform_3(%arg0: i32) -> (i32, i32) {
    %c0_i32 = arith.constant 0 : i32
    %c0_i32_0 = arith.constant 0 : i32
    return %arg0, %c0_i32 : i32, i32
  }
}

</mosaic_0001>

<bundles_post_ra>
// kernel: tpu_custom_call.1
= control target key start
LH: loop header
LB: loop body
LE: loop exit
PB: predicated region body
PF: predicated region fallthrough
CT: control target
= control target key end

     0   :  { %9 = vsyncpa [#allocation3], 0  ;;  %s1395_s0 = inlined_call_operand.vmem [shape: bf16[768,36], index: 0, kind: input, shape index: {}]   ;;  %s1396_s1 = inlined_call_operand.vmem [shape: bf16[36,128], index: 1, kind: input, shape index: {}]   ;;  %s1397_s2 = inlined_call_operand.hbm [shape: f32[768,128], index: 2, kind: output, shape index: {0}]   ;;  %s1398_s3 = inlined_call_operand.hbm [shape: f32[24,128], index: 3, kind: output, shape index: {1}]  }
   0x1   :  { %11 = vsyncpa [#allocation3 + $0x1], 0 }
   0x2   :  { %12 = vsyncpa [#allocation5], 0 }
   0x3   :  { %14 = vsyncpa [#allocation5 + $0x1], 0  ;;  %s1099_s12 = smov 0   ;;  %s1101_s13 = smov 0  }
   0x4   :  { %s1103_s14 = smov 0   ;;  %s1105_s15 = smov 0  }
   0x5 LB: > { %s1120_s16 = sadd.s32 4294967295, %s1073_s15   ;;  %s802_s17 = sadd.s32 4294967294, %s1073_s15   ;;  %s1073_s15 = sphi %s1105_s15, %s1404_s15   ;;  %s1069_s14 = sphi %s1103_s14, %s1403_s14   ;;  %s1065_s13 = sphi %s1101_s13, %s1402_s13   ;;  %s1061_s12 = sphi %s1099_s12, %s1401_s12  }
   0x6   : > { %s1124_s18 = sadd.s32 1, %s1073_s15   ;;  %s74_s19 = sadd.s32 1, %s1069_s14 }
   0x7   : > { %s71_s20 = ssub.s32 %s1073_s15, %s1124_s18  ;;  %p84_p0 = scmp.ne.s32.totalorder %s1069_s14, %s1065_s13 }
   0x8   : > { %p72_p1 = scmp.eq.s32.totalorder %s71_s20, 0  ;;  %p85_p2 = scmp.eq.s32.totalorder %s1120_s16, 2 }
   0x9   : > { %p90_p3 = scmp.ne.s32.totalorder %s1065_s13, %s1061_s12  ;;  %p91_p4 = scmp.eq.s32.totalorder %s802_s17, 2 }
   0xa   : > { %s1135_s21 = scalar_select %p72_p1, %s1069_s14, %s74_s19  }
   0xb   : > { %p1137_p5 = por %p85_p2, %p84_p0  ;;  %p1141_p6 = por %p91_p4, %p90_p3 }
   0xc   : > { %p805_p7 = scmp.ge.s32.totalorder %s1073_s15, 1  ;;  %p147_p8 = scmp.lt.s32.totalorder %s1073_s15, 4 }
   0xe   : > { %p148_p9 = pnand %p805_p7, %p147_p8 }
   0xf   : > { %s808_s28 = sshll.u32 (!%p148_p9), %s1120_s16, 5  ;;  %s1195_s8 = sand.u32 (!%p148_p9), 1, %s1065_s13  }
  0x10   : > { %151 = sbr.rel (%p148_p9) target bundleno = 335 (0x14f), region = 28  ;;  %p177_p10 = scmp.lt.s32.totalorder (!%p148_p9), %s808_s28, 95 }
  0x11   : > { %s806_s9 = sshll.u32 (!%p148_p9), %s1195_s8, 8  ;;  %s852_s11 = sshll.u32 (!%p148_p9), %s1120_s16, 12 }
  0x12   : > { %s1198_s10 = scalar_lea.vmem (!%p148_p9), [#allocation2], %s806_s9  ;;  %s1279_s24 = scalar_lea.hbm (!%p148_p9), %s1397_s2, %s852_s11 }
  0x13   : > { %s695_s17 = sshll.u32 (!%p148_p9), %s1198_s10, 4  ;;  %s677_s25 = scalar_lea.sflag (!%p148_p9), [#allocation3], %s1195_s8  ;;  %s1281_s17 = int_to_ptr.vmem [resolvable:$true] %s695_s17 }
  0x14   : > { %s983_s26 = scalar_lea.vmem (!%p148_p9), %s1281_s17, 4096  ;;  %s1075_s27 = smov (!%p148_p9), [#allocation2]  }
  0x15   : > { %v964_v0 = vld [vmem:[%s1396_s1 + $0x10] ss:$0 sps:$4 sm:$0x33]   ;;  %vm365_vm0 = vcmask 1041408   ;;  %v965_v1 = vld [vmem:[%s1396_s1 + $0x8] sm:$0xff]   ;;  %v966_v3 = vld [vmem:[%s1396_s1] sm:$0xff]   ;;  %p984_p11 = scmp.ne.s32.totalorder %s1281_s17, %s983_s26 }
  0x16   : > { %916 = vmatprep.subr.msk.bf16.mxu0 %vm365_vm0, %v964_v0  ;;  %v367_v2 = vsel %vm365_vm0, %v964_v0, 0  ;;  %917 = vmatprep.subr.msk.bf16.mxu1 %vm365_vm0, %v964_v0  ;;  %s1406_s28 = smov (!%p177_p10, %s808_s28), 95  ;;  %vm316_vm1 = vcmask 293888  }
  0x17   : > { %873 = vmatpush3.bf16.msra.mxu0 %v367_v2  ;;  %913 = vmatpush3.bf16.msra.mxu1 %v367_v2  ;;  %s809_s4 = sshll.u32 %s1406_s28, 2  ;;  %p985_p12 = pnand %p984_p11, %p1137_p5 }
  0x18   : > { %874 = vmatprep.subr.bf16.mxu0 %v965_v1  ;;  %911 = vmatprep.subr.bf16.mxu1 %v965_v1  ;;  %s1160_s7 = scalar_lea.vmem %s1395_s0, %s809_s4  ;;  %s987_s28 = sshll.u32 %s1075_s27, 4  ;;  %s988_s28 = int_to_ptr.vmem [resolvable:$false] %s987_s28 }
  0x19   : > { %v967_v4 = vld [vmem:[%s1160_s7] sm:$0xff]   ;;  %v968_v5 = vld [vmem:[%s1160_s7 + $0x8] sm:$0xff]   ;;  %v969_v6 = vld [vmem:[%s1160_s7 + $0x10] sm:$0xff]   ;;  %p986_p13 = pneg %p985_p12  ;;  %s989_s29 = scalar_lea.vmem %s988_s28, 8192 }
  0x1a   : > { %878 = vmatprep.mubr.msk.bf16.mxu0 %vm316_vm1, %v967_v4  ;;  %v970_v7 = vld [vmem:[%s1160_s7 + $0x18] sm:$0xff]   ;;  %v971_v8 = vld [vmem:[%s1160_s7 + $0x20] sm:$0xff]   ;;  %v976_v10 = vld [vmem:[%s1160_s7 + $0x48] sm:$0xff]   ;;  %p990_p0 = scmp.lt.s32.totalorder %s1281_s17, %s988_s28  ;;  %p991_p1 = scmp.lt.s32.totalorder %s989_s29, %s983_s26 }
  0x1b   : > { %875 = vmatpush3.bf16.msra.mxu0 %v965_v1  ;;  %914 = vmatpush3.bf16.msra.mxu1 %v965_v1  ;;  %v975_v9 = vld [vmem:[%s1160_s7 + $0x40] sm:$0xff]   ;;  %v977_v11 = vld [vmem:[%s1160_s7 + $0x50] sm:$0xff]   ;;  %v978_v12 = vld [vmem:[%s1160_s7 + $0x58] sm:$0xff]  }
  0x1c   : > { %876 = vmatprep.subr.bf16.mxu0 %v966_v3  ;;  %912 = vmatprep.subr.bf16.mxu1 %v966_v3  ;;  %v979_v13 = vld [vmem:[%s1160_s7 + $0x60] sm:$0xff]   ;;  %v972_v14 = vld [vmem:[%s1160_s7 + $0x28] sm:$0xff]   ;;  %v973_v15 = vld [vmem:[%s1160_s7 + $0x30] sm:$0xff]   ;;  %p992_p2 = por %p991_p1, %p990_p0 }
  0x1d   : > { %894 = vmatprep.mubr.msk.bf16.mxu1 %vm316_vm1, %v975_v9  ;;  %v980_v16 = vld [vmem:[%s1160_s7 + $0x68] sm:$0xff]   ;;  %v981_v17 = vld [vmem:[%s1160_s7 + $0x70] sm:$0xff]   ;;  %v974_v18 = vld [vmem:[%s1160_s7 + $0x38] sm:$0xff]  }
  0x1e   : > { %v982_v19 = vld [vmem:[%s1160_s7 + $0x78] sm:$0xff]   ;;  %p993_p3 = pnand %p992_p2, %p986_p13 }
  0x1f   : > { %877 = vmatpush3.bf16.msra.mxu0 %v966_v3  ;;  %915 = vmatpush3.bf16.msra.mxu1 %v966_v3 }
  0x22   : > { %879 = vmatmul.mubr.msk.bf16.vlgmr.msra.gmra.mxu0 %vm316_vm1, %v968_v5  ;;  %895 = vmatmul.mubr.msk.bf16.vlgmr.msra.gmra.mxu1 %vm316_vm1, %v976_v10 }
  0x23   : > { %882 = vmatprep.mubr.msk.bf16.mxu0 %vm316_vm1, %v969_v6  ;;  %898 = vmatprep.mubr.msk.bf16.mxu1 %vm316_vm1, %v977_v11 }
  0x2a   : > { %883 = vmatmul.mubr.msk.bf16.gmra.mxu0 %vm316_vm1, %v970_v7  ;;  %899 = vmatmul.mubr.msk.bf16.gmra.mxu1 %vm316_vm1, %v978_v12 }
  0x2b   : > { %886 = vmatprep.mubr.msk.bf16.mxu0 %vm316_vm1, %v971_v8  ;;  %902 = vmatprep.mubr.msk.bf16.mxu1 %vm316_vm1, %v979_v13 }
  0x32   : > { %887 = vmatmul.mubr.msk.bf16.gmra.mxu0 %vm316_vm1, %v972_v14  ;;  %903 = vmatmul.mubr.msk.bf16.gmra.mxu1 %vm316_vm1, %v980_v16 }
  0x33   : > { %890 = vmatprep.mubr.msk.bf16.mxu0 %vm316_vm1, %v973_v15  ;;  %906 = vmatprep.mubr.msk.bf16.mxu1 %vm316_vm1, %v981_v17 }
  0x3a   : > { %891 = vmatmul.mubr.msk.bf16.gmra.mxu0 %vm316_vm1, %v974_v18  ;;  %907 = vmatmul.mubr.msk.bf16.gmra.mxu1 %vm316_vm1, %v982_v19 }
  0xe2   : > { %v880_v20 = vpop.f32.mrf.mxu0  ;;  %v1203_v24 = vpop.f32.mrf.mxu1 }
  0xe3   : > { %532 = vst [vmem:[%s1198_s10 + $0x10] sm:$0xff] %v880_v20  ;;  %548 = vst [vmem:[%s1198_s10 + $0x90] sm:$0xff] %v1203_v24  ;;  %v601_v30 = vmul.f32 %v880_v20, %v880_v20 }
  0xe4   : > { %v403_v21 = vpop.f32.mrf.mxu0  ;;  %v1208_v29 = vpop.f32.mrf.mxu1 }
  0xe5   : > { %530 = vst [vmem:[%s1198_s10] sm:$0xff] %v403_v21  ;;  %v599_v25 = vmul.f32 %v403_v21, %v403_v21  ;;  %546 = vst [vmem:[%s1198_s10 + $0x80] sm:$0xff] %v1208_v29 }
  0xe6   : > { %v881_v22 = vpop.f32.mrf.mxu0  ;;  %v1213_v34 = vpop.f32.mrf.mxu1 }
  0xe7   : > { %533 = vst [vmem:[%s1198_s10 + $0x18] sm:$0xff] %v881_v22  ;;  %v602_v35 = vmul.f32 %v881_v22, %v881_v22  ;;  %549 = vst [vmem:[%s1198_s10 + $0x98] sm:$0xff] %v1213_v34 }
  0xe8   : > { %v406_v23 = vpop.f32.mrf.mxu0  ;;  %v1218_v39 = vpop.f32.mrf.mxu1 }
  0xe9   : > { %531 = vst [vmem:[%s1198_s10 + $0x8] sm:$0xff] %v406_v23  ;;  %v562_v26 = vadd.f32 %v406_v23, %v403_v21  ;;  %v600_v27 = vmul.f32 %v406_v23, %v406_v23  ;;  %547 = vst [vmem:[%s1198_s10 + $0x88] sm:$0xff] %v1218_v39 }
  0xea   : > { %v884_v28 = vpop.f32.mrf.mxu0  ;;  %v1223_v44 = vpop.f32.mrf.mxu1 }
  0xeb   : > { %v563_v31 = vadd.f32 %v880_v20, %v562_v26  ;;  %v631_v32 = vadd.f32 %v600_v27, %v599_v25  ;;  %536 = vst [vmem:[%s1198_s10 + $0x30] sm:$0xff] %v884_v28  ;;  %552 = vst [vmem:[%s1198_s10 + $0xb0] sm:$0xff] %v1223_v44  ;;  %v605_v50 = vmul.f32 %v884_v28, %v884_v28 }
  0xec   : > { %v419_v33 = vpop.f32.mrf.mxu0  ;;  %v1228_v49 = vpop.f32.mrf.mxu1 }
  0xed   : > { %v632_v36 = vadd.f32 %v631_v32, %v601_v30  ;;  %534 = vst [vmem:[%s1198_s10 + $0x20] sm:$0xff] %v419_v33  ;;  %v564_v37 = vadd.f32 %v881_v22, %v563_v31  ;;  %v603_v41 = vmul.f32 %v419_v33, %v419_v33  ;;  %550 = vst [vmem:[%s1198_s10 + $0xa0] sm:$0xff] %v1228_v49 }
  0xee   : > { %v885_v38 = vpop.f32.mrf.mxu0  ;;  %v1233_v54 = vpop.f32.mrf.mxu1 }
  0xef   : > { %v565_v40 = vadd.f32 %v564_v37, %v419_v33  ;;  %v633_v42 = vadd.f32 %v632_v36, %v602_v35  ;;  %537 = vst [vmem:[%s1198_s10 + $0x38] sm:$0xff] %v885_v38  ;;  %v606_v55 = vmul.f32 %v885_v38, %v885_v38  ;;  %553 = vst [vmem:[%s1198_s10 + $0xb8] sm:$0xff] %v1233_v54 }
  0xf0   : > { %v422_v43 = vpop.f32.mrf.mxu0  ;;  %v1238_v59 = vpop.f32.mrf.mxu1  ;;  %v615_v36 = vmul.f32 %v1208_v29, %v1208_v29 }
  0xf1   : > { %v634_v45 = vadd.f32 %v633_v42, %v603_v41  ;;  %535 = vst [vmem:[%s1198_s10 + $0x28] sm:$0xff] %v422_v43  ;;  %v566_v46 = vadd.f32 %v565_v40, %v422_v43  ;;  %v604_v47 = vmul.f32 %v422_v43, %v422_v43  ;;  %551 = vst [vmem:[%s1198_s10 + $0xa8] sm:$0xff] %v1238_v59 }
  0xf2   : > { %v888_v48 = vpop.f32.mrf.mxu0  ;;  %v1243_v0 = vpop.f32.mrf.mxu1 }
  0xf3   : > { %v567_v51 = vadd.f32 %v884_v28, %v566_v46  ;;  %v635_v52 = vadd.f32 %v634_v45, %v604_v47  ;;  %540 = vst [vmem:[%s1198_s10 + $0x50] sm:$0xff] %v888_v48  ;;  %556 = vst [vmem:[%s1198_s10 + $0xd0] sm:$0xff] %v1243_v0  ;;  %v609_v6 = vmul.f32 %v888_v48, %v888_v48 }
  0xf4   : > { %v435_v53 = vpop.f32.mrf.mxu0  ;;  %v1248_v5 = vpop.f32.mrf.mxu1 }
  0xf5   : > { %v636_v56 = vadd.f32 %v635_v52, %v605_v50  ;;  %538 = vst [vmem:[%s1198_s10 + $0x40] sm:$0xff] %v435_v53  ;;  %v568_v57 = vadd.f32 %v885_v38, %v567_v51  ;;  %v607_v61 = vmul.f32 %v435_v53, %v435_v53  ;;  %554 = vst [vmem:[%s1198_s10 + $0xc0] sm:$0xff] %v1248_v5 }
  0xf6   : > { %v889_v58 = vpop.f32.mrf.mxu0  ;;  %v1253_v10 = vpop.f32.mrf.mxu1 }
  0xf7   : > { %v569_v60 = vadd.f32 %v568_v57, %v435_v53  ;;  %v637_v62 = vadd.f32 %v636_v56, %v606_v55  ;;  %541 = vst [vmem:[%s1198_s10 + $0x58] sm:$0xff] %v889_v58  ;;  %v610_v11 = vmul.f32 %v889_v58, %v889_v58  ;;  %557 = vst [vmem:[%s1198_s10 + $0xd8] sm:$0xff] %v1253_v10 }
  0xf8   : > { %v438_v63 = vpop.f32.mrf.mxu0  ;;  %v1258_v15 = vpop.f32.mrf.mxu1 }
  0xf9   : > { %v638_v1 = vadd.f32 %v637_v62, %v607_v61  ;;  %539 = vst [vmem:[%s1198_s10 + $0x48] sm:$0xff] %v438_v63  ;;  %v570_v2 = vadd.f32 %v569_v60, %v438_v63  ;;  %v608_v3 = vmul.f32 %v438_v63, %v438_v63  ;;  %555 = vst [vmem:[%s1198_s10 + $0xc8] sm:$0xff] %v1258_v15 }
  0xfa   : > { %v892_v4 = vpop.f32.mrf.mxu0  ;;  %v1263_v20 = vpop.f32.mrf.mxu1 }
  0xfb   : > { %v571_v7 = vadd.f32 %v888_v48, %v570_v2  ;;  %v639_v8 = vadd.f32 %v638_v1, %v608_v3  ;;  %544 = vst [vmem:[%s1198_s10 + $0x70] sm:$0xff] %v892_v4  ;;  %560 = vst [vmem:[%s1198_s10 + $0xf0] sm:$0xff] %v1263_v20  ;;  %v613_v26 = vmul.f32 %v892_v4, %v892_v4 }
  0xfc   : > { %v451_v9 = vpop.f32.mrf.mxu0  ;;  %v1270_v25 = vpop.f32.mrf.mxu1 }
  0xfd   : > { %v640_v12 = vadd.f32 %v639_v8, %v609_v6  ;;  %542 = vst [vmem:[%s1198_s10 + $0x60] sm:$0xff] %v451_v9  ;;  %v572_v13 = vadd.f32 %v889_v58, %v571_v7  ;;  %v611_v17 = vmul.f32 %v451_v9, %v451_v9  ;;  %558 = vst [vmem:[%s1198_s10 + $0xe0] sm:$0xff] %v1270_v25 }
  0xfe   : > { %v893_v14 = vpop.f32.mrf.mxu0  ;;  %v1274_v30 = vpop.f32.mrf.mxu1 }
  0xff   : > { %v573_v16 = vadd.f32 %v572_v13, %v451_v9  ;;  %v641_v18 = vadd.f32 %v640_v12, %v610_v11  ;;  %545 = vst [vmem:[%s1198_s10 + $0x78] sm:$0xff] %v893_v14  ;;  %v614_v31 = vmul.f32 %v893_v14, %v893_v14  ;;  %561 = vst [vmem:[%s1198_s10 + $0xf8] sm:$0xff] %v1274_v30 }
 0x100   : > { %v454_v19 = vpop.f32.mrf.mxu0  ;;  %v1285_v35 = vpop.f32.mrf.mxu1 }
 0x101   : > { %v642_v21 = vadd.f32 %v641_v18, %v611_v17  ;;  %543 = vst [vmem:[%s1198_s10 + $0x68] sm:$0xff] %v454_v19  ;;  %v574_v22 = vadd.f32 %v573_v16, %v454_v19  ;;  %v612_v23 = vmul.f32 %v454_v19, %v454_v19  ;;  %559 = vst [vmem:[%s1198_s10 + $0xe8] sm:$0xff] %v1285_v35 }
 0x103   : > { %v575_v27 = vadd.f32 %v892_v4, %v574_v22  ;;  %v643_v28 = vadd.f32 %v642_v21, %v612_v23 }
 0x105   : > { %v576_v32 = vadd.f32 %v893_v14, %v575_v27  ;;  %v644_v33 = vadd.f32 %v643_v28, %v613_v26 }
 0x107   : > { %v645_v37 = vadd.f32 %v644_v33, %v614_v31  ;;  %v577_v38 = vadd.f32 %v576_v32, %v1208_v29 }
 0x108   : > { %996 = shalt.err (!%p993_p3)
}
 0x109   : > { %s997_s30 = scalar_lea.hbm %s1279_s24, 4096  ;;  %s1001_s6 = scalar_lea.hbm %s1397_s2, 12288 }
 0x10a   : > { %p998_p4 = scmp.ne.s32.totalorder %s1279_s24, %s997_s30  ;;  %p1002_p9 = scmp.lt.s32.totalorder %s1279_s24, %s1397_s2 }
 0x10b   : > { %p1003_p10 = scmp.lt.s32.totalorder %s1001_s6, %s997_s30 }
 0x10c   : > { %p999_p7 = pnand %p998_p4, %p1137_p5 }
 0x10d   : > { %p1004_p11 = por %p1003_p10, %p1002_p9 }
 0x10e   : > { %p1000_p8 = pneg %p999_p7 }
 0x110   : > { %p1005_p12 = pnand %p1004_p11, %p1000_p8 }
 0x112   : > { %1008 = shalt.err (!%p1005_p12)
}
 0x113   : > { %s1076_s10 = smov 128   ;;  %s1077_s11 = smov 8   ;;  %v578_v29 = vadd.f32 %v577_v38, %v1218_v39  ;;  %v616_v40 = vmul.f32 %v1218_v39, %v1218_v39  ;;  %v646_v41 = vadd.f32 %v645_v37, %v615_v36  ;;  %v617_v42 = vmul.f32 %v1203_v24, %v1203_v24 }
 0x114   : > { %918 = dma.vmem_to_hbm [thread:$0]  (%p1137_p5), %s1281_s17, 4096, %s1279_s24, %s677_s25, %s1076_s10, %s1076_s10, %s1077_s11   ;;  %v618_v46 = vmul.f32 %v1213_v34, %v1213_v34  ;;  %v619_v51 = vmul.f32 %v1228_v49, %v1228_v49  ;;  %v620_v55 = vmul.f32 %v1238_v59, %v1238_v59  ;;  %v623_v61 = vmul.f32 %v1248_v5, %v1248_v5 }
 0x115   : > { %v579_v43 = vadd.f32 %v1203_v24, %v578_v29  ;;  %v647_v45 = vadd.f32 %v646_v41, %v616_v40  ;;  %v621_v24 = vmul.f32 %v1223_v44, %v1223_v44  ;;  %v624_v1 = vmul.f32 %v1258_v15, %v1258_v15  ;;  %s807_s17 = sshll.u32 %s1195_s8, 3  ;;  %s849_s19 = sshll.u32 %s1120_s16, 7 }
 0x116   : > { %v627_v7 = vmul.f32 %v1270_v25, %v1270_v25  ;;  %v628_v12 = vmul.f32 %v1285_v35, %v1285_v35  ;;  %v668_v22 = vlaneseq  ;;  %s175_s20 = scalar_lea.vmem [#allocation4], %s807_s17  ;;  %s709_s27 = scalar_lea.hbm %s1398_s3, %s849_s19 }
 0x117   : > { %v648_v47 = vadd.f32 %v647_v45, %v617_v42  ;;  %v580_v48 = vadd.f32 %v1213_v34, %v579_v43  ;;  %v622_v34 = vmul.f32 %v1233_v54, %v1233_v54  ;;  %s711_s24 = sshll.u32 %s175_s20, 4  ;;  %s682_s28 = scalar_lea.sflag [#allocation5], %s1195_s8  ;;  %s712_s24 = int_to_ptr.vmem [resolvable:$true] %s711_s24 }
 0x118   : > { %v669_v28 = vshrl.u32 %v668_v22, 7  ;;  %s1009_s29 = scalar_lea.vmem %s712_s24, 128  ;;  %s1078_s30 = smov [#allocation4]  }
 0x119   : > { %v581_v50 = vadd.f32 %v580_v48, %v1228_v49  ;;  %v649_v52 = vadd.f32 %v648_v47, %v618_v46  ;;  %p1010_p13 = scmp.ne.s32.totalorder %s712_s24, %s1009_s29  ;;  %s1013_s4 = sshll.u32 %s1078_s30, 4  ;;  %s1014_s4 = int_to_ptr.vmem [resolvable:$false] %s1013_s4 }
 0x11a   : > { %vm670_vm2 = vcmp.eq.s32.totalorder %v669_v28, 0  ;;  %vm672_vm3 = vcmp.eq.s32.totalorder %v669_v28, 1  ;;  %s1015_s16 = scalar_lea.vmem %s1014_s4, 256  ;;  %p1016_p2 = scmp.lt.s32.totalorder %s712_s24, %s1014_s4 }
 0x11b   : > { %v650_v39 = vadd.f32 %v649_v52, %v619_v51  ;;  %v582_v53 = vadd.f32 %v581_v50, %v1238_v59  ;;  %p1011_p0 = pnand %p1010_p13, %p1137_p5  ;;  %p1017_p3 = scmp.lt.s32.totalorder %s1015_s16, %s1009_s29 }
 0x11d   : > { %v583_v56 = vadd.f32 %v1223_v44, %v582_v53  ;;  %v651_v57 = vadd.f32 %v650_v39, %v620_v55  ;;  %v625_v44 = vmul.f32 %v1243_v0, %v1243_v0  ;;  %p1012_p1 = pneg %p1011_p0  ;;  %p1018_p4 = por %p1017_p3, %p1016_p2 }
 0x11f   : > { %v652_v58 = vadd.f32 %v651_v57, %v621_v24  ;;  %v584_v60 = vadd.f32 %v1233_v54, %v583_v56  ;;  %v626_v54 = vmul.f32 %v1253_v10, %v1253_v10  ;;  %p1019_p7 = pnand %p1018_p4, %p1012_p1 }
 0x121   : > { %v585_v49 = vadd.f32 %v584_v60, %v1248_v5  ;;  %v653_v62 = vadd.f32 %v652_v58, %v622_v34 }
 0x123   : > { %v654_v63 = vadd.f32 %v653_v62, %v623_v61  ;;  %v586_v59 = vadd.f32 %v585_v49, %v1258_v15 }
 0x125   : > { %v587_v2 = vadd.f32 %v1243_v0, %v586_v59  ;;  %v655_v3 = vadd.f32 %v654_v63, %v624_v1  ;;  %v629_v0 = vmul.f32 %v1263_v20, %v1263_v20 }
 0x127   : > { %v656_v4 = vadd.f32 %v655_v3, %v625_v44  ;;  %v588_v6 = vadd.f32 %v1253_v10, %v587_v2  ;;  %v630_v10 = vmul.f32 %v1274_v30, %v1274_v30 }
 0x129   : > { %v589_v5 = vadd.f32 %v588_v6, %v1270_v25  ;;  %v657_v8 = vadd.f32 %v656_v4, %v626_v54 }
 0x12b   : > { %v658_v9 = vadd.f32 %v657_v8, %v627_v7  ;;  %v590_v11 = vadd.f32 %v589_v5, %v1285_v35 }
 0x12d   : > { %v591_v13 = vadd.f32 %v1263_v20, %v590_v11  ;;  %v659_v14 = vadd.f32 %v658_v9, %v628_v12 }
 0x12f   : > { %v592_v15 = vadd.f32 %v1274_v30, %v591_v13  ;;  %v660_v16 = vadd.f32 %v659_v14, %v629_v0 }
 0x131   : > { %v593_v17 = vrot.slane %v592_v15, 4  ;;  %v661_v18 = vadd.f32 %v660_v16, %v630_v10 }
 0x133   : > { %v594_v19 = vadd.f32 %v593_v17, %v592_v15  ;;  %v662_v21 = vrot.slane %v661_v18, 4 }
 0x135   : > { %v595_v23 = vrot.slane %v594_v19, 2  ;;  %v663_v25 = vadd.f32 %v662_v21, %v661_v18 }
 0x137   : > { %v596_v26 = vadd.f32 %v595_v23, %v594_v19  ;;  %v664_v27 = vrot.slane %v663_v25, 2 }
 0x139   : > { %v597_v20 = vrot.slane %v596_v26, 1  ;;  %v665_v31 = vadd.f32 %v664_v27, %v663_v25 }
 0x13b   : > { %v598_v32 = vadd.f32 %v597_v20, %v596_v26  ;;  %v666_v33 = vrot.slane %v665_v31, 1 }
 0x13d   : > { %v667_v30 = vadd.f32 %v666_v33, %v665_v31  ;;  %v671_v35 = vsel %vm670_vm2, %v598_v32, 0.0 }
 0x13f   : > { %v673_v36 = vsel %vm672_vm3, %v667_v30, 0.0 }
 0x140   : > { %v674_v37 = vadd.f32 %v673_v36, %v671_v35 }
 0x142   : > { %675 = vst [vmem:[%s175_s20] sm:$0xff] %v674_v37 }
 0x143   : > { %1022 = shalt.err (!%p1019_p7)
}
 0x144   : > { %s1023_s5 = scalar_lea.hbm %s709_s27, 128  ;;  %s1027_s7 = scalar_lea.hbm %s1398_s3, 384 }
 0x145   : > { %p1024_p8 = scmp.ne.s32.totalorder %s709_s27, %s1023_s5  ;;  %p1028_p11 = scmp.lt.s32.totalorder %s709_s27, %s1398_s3 }
 0x146   : > { %p1029_p12 = scmp.lt.s32.totalorder %s1027_s7, %s1023_s5 }
 0x147   : > { %p1025_p9 = pnand %p1024_p8, %p1137_p5 }
 0x148   : > { %p1030_p13 = por %p1029_p12, %p1028_p11 }
 0x149   : > { %p1026_p10 = pneg %p1025_p9 }
 0x14b   : > { %p1031_p0 = pnand %p1030_p13, %p1026_p10 }
 0x14d   : > { %1034 = shalt.err (!%p1031_p0)
}
 0x14e   : > { %919 = dma.vmem_to_hbm [thread:$0]  (%p1137_p5), %s712_s24, 128, %s709_s27, %s682_s28  }
 0x14f PF: > { %p929_p1 = scmp.ge.s32.totalorder %s1073_s15, 2  ;;  %s723_s11 = sand.u32 1, %s1061_s12  }
 0x150   : > { %s724_s17 = scalar_lea.sflag [#allocation3], %s723_s11 }
 0x151   : > { %p923_p2 = pnand %p929_p1, %p1141_p6 }
 0x153   : > { %p924_p3 = pneg %p923_p2 }
 0x155   : > { %1052 = dma.done.wait (%p924_p3), %s724_s17, 4096  }
 0x156   : > { %1054 = vsyncadd (%p924_p3), %s724_s17, 4294963200  ;;  %s733_s19 = scalar_lea.sflag [#allocation5], %s723_s11 }
 0x157   : > { %1056 = dma.done.wait (%p924_p3), %s733_s19, 128  }
 0x158   : > { %1058 = vsyncadd (%p924_p3), %s733_s19, 4294967168  ;;  %p17_p5 = scmp.ge.s32.totalorder %s1124_s18, 5   ;;  %s1401_s12 = smov %s1065_s13 }
 0x159   : > { %s1402_s13 = smov %s1069_s14  ;;  %s1403_s14 = smov %s1135_s21 }
 0x15a   : > { %s1404_s15 = smov %s1124_s18  ;;  %19 = sbr.rel (!%p17_p5) target bundleno = 5 (0x5), region = 80 }
 0x15f   :  { %738 = vsyncpa [#allocation3], 1 }
 0x160   :  { %740 = vsyncpa [#allocation3 + $0x1], 1 }
 0x161   :  { %741 = vsyncpa [#allocation5], 1 }
 0x162   :  { %743 = vsyncpa [#allocation5 + $0x1], 1 }

</bundles_post_ra>
